<compile_context>
chip_gen: v5e
topology: v5e:2x2
jax: 0.10.0
libtpu: 0.0.40
codegen_flags: <defaults>
</compile_context>

<pallas_src>
import math

import jax
import jax.numpy as jnp
from jax.experimental import pallas as pl
from jax.experimental.pallas import tpu as pltpu

BN_EPS = 1e-5                      # PyTorch BatchNorm1d default
LANES = 128                        # hidden feature padding (one vreg lane width)
DIMS = [28, 56, 56, 28, 1]         # in -> h0 -> h1 -> h2 -> out
ROW_TILE_MAX = 256                 # batch rows per grid step


# ----------------------------------------------------------------------------
# Fused kernel: one batch tile through the whole network.
# ----------------------------------------------------------------------------
def _credit_kernel(x_ref,
                   w1_ref, s1_ref, t1_ref,
                   w2_ref, s2_ref, t2_ref,
                   w3_ref, s3_ref, t3_ref,
                   w4_ref, b4_ref,
                   o_ref):
    f32 = jnp.float32
    bf16 = jnp.bfloat16

    def layer(h, w_r, s_r, t_r):
        # Linear on the MXU (bf16 operands, f32 accumulation), then
        # BatchNorm folded to scale/shift (bias folded into shift), then ReLU.
        y = jnp.dot(h.astype(bf16), w_r[...], preferred_element_type=f32)
        y = y * s_r[...] + t_r[...]
        return jnp.maximum(y, 0.0)

    h = layer(x_ref[...], w1_ref, s1_ref, t1_ref)
    # TODO(synk): Dropout(0.5) -> identity (eval-mode forward).
    h = layer(h, w2_ref, s2_ref, t2_ref)
    # TODO(synk): Dropout(0.5) -> identity (eval-mode forward).
    h = layer(h, w3_ref, s3_ref, t3_ref)

    # Final Linear to 1 output: elementwise mul + lane reduction (XLU) is
    # cheaper and more robust than an N=1 MXU matmul.
    logit = jnp.sum(h * w4_ref[...], axis=-1, keepdims=True) + b4_ref[...]
    o_ref[...] = pl.reciprocal(1.0 + jnp.exp(-logit), approx=True)


# ----------------------------------------------------------------------------
# Wrapper
# ----------------------------------------------------------------------------
def credit_forward(packed, x):
    """packed: tuple from pack_params(); x: (B, 28) -> (B, 1) probabilities."""
    b, fin = x.shape
    assert fin == DIMS[0]

    # Bucket rows to a power of two (>= 8) so batch-size changes don't recompile.
    b_pad = max(8, 1 << (b - 1).bit_length())
    tb = min(b_pad, ROW_TILE_MAX)
    grid = (b_pad // tb,)

    xp = x.astype(jnp.float32)
    if b_pad != b:
        xp = jnp.zeros((b_pad, fin), jnp.float32).at[:b].set(xp)

    in_specs = [pl.BlockSpec((tb, fin), lambda i: (i, 0))]
    in_specs += [pl.BlockSpec(a.shape, lambda i: (0, 0)) for a in packed]

    out = pl.pallas_call(
        _credit_kernel,
        out_shape=jax.ShapeDtypeStruct((b_pad, 1), jnp.float32),
        grid=grid,
        in_specs=in_specs,
        out_specs=pl.BlockSpec((tb, 1), lambda i: (i, 0)),
        compiler_params=pltpu.CompilerParams(
            dimension_semantics=("parallel",),
            vmem_limit_bytes=32 * 1024 * 1024),
    )(xp, *packed)
    return out[:b]


credit_forward_jit = jax.jit(credit_forward)


# ----------------------------------------------------------------------------
# Parameters: PyTorch-like init (kaiming_normal_ relu weights, zero bias,
# fresh BN gamma=1 / beta=0 / running_mean=0 / running_var=1).
# ----------------------------------------------------------------------------
def init_params(key):
    params = {}
    for i in range(4):
        fan_in, fan_out = DIMS[i], DIMS[i + 1]
        key, kw = jax.random.split(key)
        w = jax.random.normal(kw, (fan_in, fan_out), jnp.float32)
        params[f"w{i+1}"] = w * math.sqrt(2.0 / fan_in)
        params[f"b{i+1}"] = jnp.zeros((fan_out,), jnp.float32)
        if i < 3:
            params[f"gamma{i+1}"] = jnp.ones((fan_out,), jnp.float32)
            params[f"beta{i+1}"] = jnp.zeros((fan_out,), jnp.float32)
            params[f"rm{i+1}"] = jnp.zeros((fan_out,), jnp.float32)
            params[f"rv{i+1}"] = jnp.ones((fan_out,), jnp.float32)
    return params


def pack_params(params):
    """Fold BN (eval-mode running stats) + bias into per-layer scale/shift and
    pad feature dims to 128 lanes (padded lanes get scale=shift=0)."""
    ops = []
    for i in range(1, 4):
        fan_in, fan_out = DIMS[i - 1], DIMS[i]
        in_pad = DIMS[0] if i == 1 else LANES
        wp = jnp.zeros((in_pad, LANES), jnp.bfloat16)
        wp = wp.at[:fan_in, :fan_out].set(params[f"w{i}"].astype(jnp.bfloat16))
        scale = params[f"gamma{i}"] * jax.lax.rsqrt(params[f"rv{i}"] + BN_EPS)
        shift = params[f"beta{i}"] + (params[f"b{i}"] - params[f"rm{i}"]) * scale
        sp = jnp.zeros((1, LANES), jnp.float32).at[0, :fan_out].set(scale)
        tp = jnp.zeros((1, LANES), jnp.float32).at[0, :fan_out].set(shift)
        ops += [wp, sp, tp]
    w4 = jnp.zeros((1, LANES), jnp.float32).at[0, :DIMS[3]].set(params["w4"][:, 0])
    b4 = params["b4"].reshape(1, 1).astype(jnp.float32)
    ops += [w4, b4]
    return tuple(ops)


# ----------------------------------------------------------------------------
# Pure-JAX reference (same eval-mode semantics, same bf16 matmul operands).
# ----------------------------------------------------------------------------
def reference_forward(params, x):
    h = x.astype(jnp.float32)
    for i in range(1, 4):
        y = jnp.dot(h.astype(jnp.bfloat16),
                    params[f"w{i}"].astype(jnp.bfloat16),
                    preferred_element_type=jnp.float32) + params[f"b{i}"]
        y = (y - params[f"rm{i}"]) * jax.lax.rsqrt(params[f"rv{i}"] + BN_EPS)
        y = y * params[f"gamma{i}"] + params[f"beta{i}"]
        h = jnp.maximum(y, 0.0)   # Dropout(0.5) -> identity in eval mode
    logit = h @ params["w4"] + params["b4"]
    return jax.nn.sigmoid(logit)


if __name__ == "__main__":
    key = jax.random.PRNGKey(0)
    pkey, xkey = jax.random.split(key)
    params = init_params(pkey)
    packed = pack_params(params)

    batch = 50                               # not a multiple of 8 -> row bucketing path
    x = jax.random.normal(xkey, (batch, DIMS[0]), jnp.float32)

    out = credit_forward_jit(packed, x)
    out = jax.block_until_ready(out)

    assert out.shape == (batch, 1), out.shape
    assert bool(jnp.all(jnp.isfinite(out)))
    assert bool(jnp.all((out >= 0.0) & (out <= 1.0)))

    ref = reference_forward(params, x)
    err = float(jnp.max(jnp.abs(out - ref)))
    assert err < 5e-3, err

    print("KERNEL_OK")
</pallas_src>

<mosaic_0001>
module attributes {stable_mosaic.version = 11 : i64} {
  func.func @_credit_kernel(%arg0: i32, %arg1: memref<64x28xf32, #tpu.memory_space<vmem>>, %arg2: memref<28x128xbf16, #tpu.memory_space<vmem>>, %arg3: memref<1x128xf32, #tpu.memory_space<vmem>>, %arg4: memref<1x128xf32, #tpu.memory_space<vmem>>, %arg5: memref<128x128xbf16, #tpu.memory_space<vmem>>, %arg6: memref<1x128xf32, #tpu.memory_space<vmem>>, %arg7: memref<1x128xf32, #tpu.memory_space<vmem>>, %arg8: memref<128x128xbf16, #tpu.memory_space<vmem>>, %arg9: memref<1x128xf32, #tpu.memory_space<vmem>>, %arg10: memref<1x128xf32, #tpu.memory_space<vmem>>, %arg11: memref<1x128xf32, #tpu.memory_space<vmem>>, %arg12: memref<1x1xf32, #tpu.memory_space<vmem>>, %arg13: memref<64x1xf32, #tpu.memory_space<vmem>>) attributes {dimension_semantics = [#tpu.dimension_semantics<parallel>], iteration_bounds = array<i64: 1>, scalar_prefetch = 0 : i64, scratch_operands = 0 : i64, tpu.core_type = #tpu.core_type<tc>, window_params = [{transform_indices = @transform_0, window_bounds = array<i64: 64, 28>}, {pipeline_mode = #tpu.pipeline_mode<synchronous>, transform_indices = @transform_1, window_bounds = array<i64: 28, 128>}, {pipeline_mode = #tpu.pipeline_mode<synchronous>, transform_indices = @transform_2, window_bounds = array<i64: 1, 128>}, {pipeline_mode = #tpu.pipeline_mode<synchronous>, transform_indices = @transform_3, window_bounds = array<i64: 1, 128>}, {pipeline_mode = #tpu.pipeline_mode<synchronous>, transform_indices = @transform_4, window_bounds = array<i64: 128, 128>}, {pipeline_mode = #tpu.pipeline_mode<synchronous>, transform_indices = @transform_5, window_bounds = array<i64: 1, 128>}, {pipeline_mode = #tpu.pipeline_mode<synchronous>, transform_indices = @transform_6, window_bounds = array<i64: 1, 128>}, {pipeline_mode = #tpu.pipeline_mode<synchronous>, transform_indices = @transform_7, window_bounds = array<i64: 128, 128>}, {pipeline_mode = #tpu.pipeline_mode<synchronous>, transform_indices = @transform_8, window_bounds = array<i64: 1, 128>}, {pipeline_mode = #tpu.pipeline_mode<synchronous>, transform_indices = @transform_9, window_bounds = array<i64: 1, 128>}, {pipeline_mode = #tpu.pipeline_mode<synchronous>, transform_indices = @transform_10, window_bounds = array<i64: 1, 128>}, {pipeline_mode = #tpu.pipeline_mode<synchronous>, transform_indices = @transform_11, window_bounds = array<i64: 1, 1>}, {transform_indices = @transform_12, window_bounds = array<i64: 64, 1>}]} {
    %c0 = arith.constant 0 : index
    %c0_0 = arith.constant 0 : index
    %0 = vector.load %arg1[%c0, %c0_0] : memref<64x28xf32, #tpu.memory_space<vmem>>, vector<64x28xf32>
    %1 = arith.truncf %0 : vector<64x28xf32> to vector<64x28xbf16>
    %c0_1 = arith.constant 0 : index
    %c0_2 = arith.constant 0 : index
    %2 = vector.load %arg2[%c0_1, %c0_2] : memref<28x128xbf16, #tpu.memory_space<vmem>>, vector<28x128xbf16>
    %cst = arith.constant dense<0.000000e+00> : vector<64x128xf32>
    %3 = tpu.matmul %1, %2, %cst {dimension_numbers = #tpu.dot_dimension_numbers<[1], [0], [0], [1], [0, 0, 1, 1], [], []>} : vector<64x28xbf16>, vector<28x128xbf16>, vector<64x128xf32> -> vector<64x128xf32>
    %c0_3 = arith.constant 0 : index
    %c0_4 = arith.constant 0 : index
    %4 = vector.load %arg3[%c0_3, %c0_4] : memref<1x128xf32, #tpu.memory_space<vmem>>, vector<1x128xf32>
    %5 = vector.broadcast %4 : vector<1x128xf32> to vector<64x128xf32>
    %6 = arith.mulf %3, %5 : vector<64x128xf32>
    %c0_5 = arith.constant 0 : index
    %c0_6 = arith.constant 0 : index
    %7 = vector.load %arg4[%c0_5, %c0_6] : memref<1x128xf32, #tpu.memory_space<vmem>>, vector<1x128xf32>
    %8 = vector.broadcast %7 : vector<1x128xf32> to vector<64x128xf32>
    %9 = arith.addf %6, %8 : vector<64x128xf32>
    %cst_7 = arith.constant 0.000000e+00 : f32
    %10 = vector.broadcast %cst_7 : f32 to vector<64x128xf32>
    %11 = arith.maximumf %9, %10 : vector<64x128xf32>
    %12 = arith.truncf %11 : vector<64x128xf32> to vector<64x128xbf16>
    %c0_8 = arith.constant 0 : index
    %c0_9 = arith.constant 0 : index
    %13 = vector.load %arg5[%c0_8, %c0_9] : memref<128x128xbf16, #tpu.memory_space<vmem>>, vector<128x128xbf16>
    %cst_10 = arith.constant dense<0.000000e+00> : vector<64x128xf32>
    %14 = tpu.matmul %12, %13, %cst_10 {dimension_numbers = #tpu.dot_dimension_numbers<[1], [0], [0], [1], [0, 0, 1, 1], [], []>} : vector<64x128xbf16>, vector<128x128xbf16>, vector<64x128xf32> -> vector<64x128xf32>
    %c0_11 = arith.constant 0 : index
    %c0_12 = arith.constant 0 : index
    %15 = vector.load %arg6[%c0_11, %c0_12] : memref<1x128xf32, #tpu.memory_space<vmem>>, vector<1x128xf32>
    %16 = vector.broadcast %15 : vector<1x128xf32> to vector<64x128xf32>
    %17 = arith.mulf %14, %16 : vector<64x128xf32>
    %c0_13 = arith.constant 0 : index
    %c0_14 = arith.constant 0 : index
    %18 = vector.load %arg7[%c0_13, %c0_14] : memref<1x128xf32, #tpu.memory_space<vmem>>, vector<1x128xf32>
    %19 = vector.broadcast %18 : vector<1x128xf32> to vector<64x128xf32>
    %20 = arith.addf %17, %19 : vector<64x128xf32>
    %cst_15 = arith.constant 0.000000e+00 : f32
    %21 = vector.broadcast %cst_15 : f32 to vector<64x128xf32>
    %22 = arith.maximumf %20, %21 : vector<64x128xf32>
    %23 = arith.truncf %22 : vector<64x128xf32> to vector<64x128xbf16>
    %c0_16 = arith.constant 0 : index
    %c0_17 = arith.constant 0 : index
    %24 = vector.load %arg8[%c0_16, %c0_17] : memref<128x128xbf16, #tpu.memory_space<vmem>>, vector<128x128xbf16>
    %cst_18 = arith.constant dense<0.000000e+00> : vector<64x128xf32>
    %25 = tpu.matmul %23, %24, %cst_18 {dimension_numbers = #tpu.dot_dimension_numbers<[1], [0], [0], [1], [0, 0, 1, 1], [], []>} : vector<64x128xbf16>, vector<128x128xbf16>, vector<64x128xf32> -> vector<64x128xf32>
    %c0_19 = arith.constant 0 : index
    %c0_20 = arith.constant 0 : index
    %26 = vector.load %arg9[%c0_19, %c0_20] : memref<1x128xf32, #tpu.memory_space<vmem>>, vector<1x128xf32>
    %27 = vector.broadcast %26 : vector<1x128xf32> to vector<64x128xf32>
    %28 = arith.mulf %25, %27 : vector<64x128xf32>
    %c0_21 = arith.constant 0 : index
    %c0_22 = arith.constant 0 : index
    %29 = vector.load %arg10[%c0_21, %c0_22] : memref<1x128xf32, #tpu.memory_space<vmem>>, vector<1x128xf32>
    %30 = vector.broadcast %29 : vector<1x128xf32> to vector<64x128xf32>
    %31 = arith.addf %28, %30 : vector<64x128xf32>
    %cst_23 = arith.constant 0.000000e+00 : f32
    %32 = vector.broadcast %cst_23 : f32 to vector<64x128xf32>
    %33 = arith.maximumf %31, %32 : vector<64x128xf32>
    %c0_24 = arith.constant 0 : index
    %c0_25 = arith.constant 0 : index
    %34 = vector.load %arg11[%c0_24, %c0_25] : memref<1x128xf32, #tpu.memory_space<vmem>>, vector<1x128xf32>
    %35 = vector.broadcast %34 : vector<1x128xf32> to vector<64x128xf32>
    %36 = arith.mulf %33, %35 : vector<64x128xf32>
    %cst_26 = arith.constant dense<0.000000e+00> : vector<64xf32>
    %37 = vector.multi_reduction <add>, %36, %cst_26 [1] : vector<64x128xf32> to vector<64xf32>
    %38 = vector.shape_cast %37 : vector<64xf32> to vector<64x1xf32>
    %c0_27 = arith.constant 0 : index
    %c0_28 = arith.constant 0 : index
    %39 = vector.load %arg12[%c0_27, %c0_28] : memref<1x1xf32, #tpu.memory_space<vmem>>, vector<1x1xf32>
    %40 = vector.broadcast %39 : vector<1x1xf32> to vector<64x1xf32>
    %41 = arith.addf %38, %40 : vector<64x1xf32>
    %cst_29 = arith.constant 0.000000e+00 : f32
    %42 = vector.broadcast %cst_29 : f32 to vector<64x1xf32>
    %43 = arith.subf %42, %41 : vector<64x1xf32>
    %44 = math.exp %43 : vector<64x1xf32>
    %cst_30 = arith.constant 1.000000e+00 : f32
    %45 = vector.broadcast %cst_30 : f32 to vector<64x1xf32>
    %46 = arith.addf %45, %44 : vector<64x1xf32>
    %47 = tpu.reciprocal %46 {approx = true} : vector<64x1xf32> -> vector<64x1xf32>
    %c0_31 = arith.constant 0 : index
    %c0_32 = arith.constant 0 : index
    %48 = vector.load %arg13[%c0_31, %c0_32] : memref<64x1xf32, #tpu.memory_space<vmem>>, vector<64x1xf32>
    tpu.vector_store %arg13[%c0_31, %c0_32], %47 {strides = array<i32>} : memref<64x1xf32, #tpu.memory_space<vmem>>, vector<64x1xf32>,
    return
  }
  func.func @transform_0(%arg0: i32) -> (i32, i32) {
    %c0_i32 = arith.constant 0 : i32
    %c0_i32_0 = arith.constant 0 : i32
    return %arg0, %c0_i32 : i32, i32
  }
  func.func @transform_1(%arg0: i32) -> (i32, i32) {
    %c0_i32 = arith.constant 0 : i32
    %c0_i32_0 = arith.constant 0 : i32
    %c0_i32_1 = arith.constant 0 : i32
    return %c0_i32, %c0_i32_0 : i32, i32
  }
  func.func @transform_2(%arg0: i32) -> (i32, i32) {
    %c0_i32 = arith.constant 0 : i32
    %c0_i32_0 = arith.constant 0 : i32
    %c0_i32_1 = arith.constant 0 : i32
    return %c0_i32, %c0_i32_0 : i32, i32
  }
  func.func @transform_3(%arg0: i32) -> (i32, i32) {
    %c0_i32 = arith.constant 0 : i32
    %c0_i32_0 = arith.constant 0 : i32
    %c0_i32_1 = arith.constant 0 : i32
    return %c0_i32, %c0_i32_0 : i32, i32
  }
  func.func @transform_4(%arg0: i32) -> (i32, i32) {
    %c0_i32 = arith.constant 0 : i32
    %c0_i32_0 = arith.constant 0 : i32
    %c0_i32_1 = arith.constant 0 : i32
    return %c0_i32, %c0_i32_0 : i32, i32
  }
  func.func @transform_5(%arg0: i32) -> (i32, i32) {
    %c0_i32 = arith.constant 0 : i32
    %c0_i32_0 = arith.constant 0 : i32
    %c0_i32_1 = arith.constant 0 : i32
    return %c0_i32, %c0_i32_0 : i32, i32
  }
  func.func @transform_6(%arg0: i32) -> (i32, i32) {
    %c0_i32 = arith.constant 0 : i32
    %c0_i32_0 = arith.constant 0 : i32
    %c0_i32_1 = arith.constant 0 : i32
    return %c0_i32, %c0_i32_0 : i32, i32
  }
  func.func @transform_7(%arg0: i32) -> (i32, i32) {
    %c0_i32 = arith.constant 0 : i32
    %c0_i32_0 = arith.constant 0 : i32
    %c0_i32_1 = arith.constant 0 : i32
    return %c0_i32, %c0_i32_0 : i32, i32
  }
  func.func @transform_8(%arg0: i32) -> (i32, i32) {
    %c0_i32 = arith.constant 0 : i32
    %c0_i32_0 = arith.constant 0 : i32
    %c0_i32_1 = arith.constant 0 : i32
    return %c0_i32, %c0_i32_0 : i32, i32
  }
  func.func @transform_9(%arg0: i32) -> (i32, i32) {
    %c0_i32 = arith.constant 0 : i32
    %c0_i32_0 = arith.constant 0 : i32
    %c0_i32_1 = arith.constant 0 : i32
    return %c0_i32, %c0_i32_0 : i32, i32
  }
  func.func @transform_10(%arg0: i32) -> (i32, i32) {
    %c0_i32 = arith.constant 0 : i32
    %c0_i32_0 = arith.constant 0 : i32
    %c0_i32_1 = arith.constant 0 : i32
    return %c0_i32, %c0_i32_0 : i32, i32
  }
  func.func @transform_11(%arg0: i32) -> (i32, i32) {
    %c0_i32 = arith.constant 0 : i32
    %c0_i32_0 = arith.constant 0 : i32
    %c0_i32_1 = arith.constant 0 : i32
    return %c0_i32, %c0_i32_0 : i32, i32
  }
  func.func @transform_12(%arg0: i32) -> (i32, i32) {
    %c0_i32 = arith.constant 0 : i32
    %c0_i32_0 = arith.constant 0 : i32
    return %arg0, %c0_i32 : i32, i32
  }
}

</mosaic_0001>

<bundles_post_ra>
// kernel: credit_forward.1
= control target key start
LH: loop header
LB: loop body
LE: loop exit
PB: predicated region body
PF: predicated region fallthrough
CT: control target
= control target key end

     0   :  { %vm84_vm0 = vcmask 1045504   ;;  %vm71_vm1 = vcmask 228352   ;;  %vm487_vm2 = vcmask 7168   ;;  %s866_s1 = inlined_call_operand.vmem [shape: bf16[28,128], index: 1, kind: input, shape index: {}]   ;;  %s867_s0 = inlined_call_operand.vmem [shape: f32[64,28], index: 0, kind: input, shape index: {}]   ;;  %s868_s2 = inlined_call_operand.vmem [shape: f32[1,128], index: 2, kind: input, shape index: {}]   ;;  %s869_s3 = inlined_call_operand.vmem [shape: f32[1,128], index: 3, kind: input, shape index: {}]   ;;  %s870_s4 = inlined_call_operand.vmem [shape: bf16[128,128], index: 4, kind: input, shape index: {}]   ;;  %s871_s5 = inlined_call_operand.vmem [shape: f32[1,128], index: 5, kind: input, shape index: {}]   ;;  %s872_s6 = inlined_call_operand.vmem [shape: f32[1,128], index: 6, kind: input, shape index: {}]   ;;  %s873_s7 = inlined_call_operand.vmem [shape: bf16[128,128], index: 7, kind: input, shape index: {}]   ;;  %s874_s8 = inlined_call_operand.vmem [shape: f32[1,128], index: 8, kind: input, shape index: {}]   ;;  %s875_s9 = inlined_call_operand.vmem [shape: f32[1,128], index: 9, kind: input, shape index: {}]   ;;  %s876_s10 = inlined_call_operand.vmem [shape: f32[1,128], index: 10, kind: input, shape index: {}]   ;;  %s877_s11 = inlined_call_operand.<no memory space> [shape: f32[1,1], index: 11, kind: input, shape index: {}]   ;;  %s878_s12 = inlined_call_operand.vmem [shape: f32[64,1], index: 12, kind: output, shape index: {}]  }
   0x1   :  { %v506_v0 = vld [vmem:[%s866_s1 + $0x8] sm:$0xf]  ;;  %v577_v1 = vld [vmem:[%s866_s1 + $0x8] sm:$0x30]  ;;  %v576_v4 = vld [vmem:[%s866_s1] sm:$0xff] }
   0x2   :  { %v507_v2 = vor.u32 %v577_v1, %v506_v0  ;;  %v44_v5 = vld [vmem:[%s867_s0] sm:$0xff]  ;;  %v45_v6 = vld [vmem:[%s867_s0 + $0x8] sm:$0xff]  ;;  %v46_v8 = vld [vmem:[%s867_s0 + $0x10] sm:$0xff] }
   0x3   :  { %v52_v7 = vpack.c.bf16 %v45_v6, %v44_v5  ;;  %v47_v9 = vld [vmem:[%s867_s0 + $0x18] sm:$0xff]  ;;  %v584_v12 = vld [vmem:[%s870_s4 + $0x30] sm:$0xff]  ;;  %v583_v13 = vld [vmem:[%s870_s4 + $0x28] sm:$0xff] }
   0x4   :  { %v86_v3 = vsel %vm84_vm0, %v507_v2, 0  ;;  %v53_v10 = vpack.c.bf16 %v47_v9, %v46_v8  ;;  %v585_v11 = vld [vmem:[%s870_s4 + $0x38] sm:$0xff]  ;;  %v48_v14 = vld [vmem:[%s867_s0 + $0x20] sm:$0xff]  ;;  %v49_v15 = vld [vmem:[%s867_s0 + $0x28] sm:$0xff] }
   0x5   :  { %94 = vmatpush.bf16.msra.mxu0 %v86_v3  ;;  %217 = vmatpush.bf16.msra.mxu1 %v585_v11  ;;  %v582_v16 = vld [vmem:[%s870_s4 + $0x20] sm:$0xff]  ;;  %v54_v17 = vpack.c.bf16 %v49_v15, %v48_v14  ;;  %v50_v18 = vld [vmem:[%s867_s0 + $0x30] sm:$0xff]  ;;  %v51_v19 = vld [vmem:[%s867_s0 + $0x38] sm:$0xff] }
   0x6   :  { %594 = vmatpush.bf16.msra.mxu3 %v585_v11  ;;  %v55_v20 = vpack.c.bf16 %v51_v19, %v50_v18  ;;  %v581_v21 = vld [vmem:[%s870_s4 + $0x18] sm:$0xff]  ;;  %v580_v22 = vld [vmem:[%s870_s4 + $0x10] sm:$0xff]  ;;  %v579_v23 = vld [vmem:[%s870_s4 + $0x8] sm:$0xff] }
   0x7   :  { %v578_v24 = vld [vmem:[%s870_s4] sm:$0xff]  ;;  %v593_v46 = vld [vmem:[%s873_s7 + $0x38] sm:$0xff]  ;;  %v592_v47 = vld [vmem:[%s873_s7 + $0x30] sm:$0xff] }
   0x8   :  { %v610_v26 = vld [vmem:[%s868_s2] ss:$0 sm:$0xff]  ;;  %602 = vmatpush.bf16.msra.mxu2 %v593_v46  ;;  %v591_v49 = vld [vmem:[%s873_s7 + $0x28] sm:$0xff]  ;;  %v589_v3 = vld [vmem:[%s873_s7 + $0x18] sm:$0xff] }
   0x9   :  { %95 = vmatpush.bf16.msra.mxu0 %v576_v4  ;;  %218 = vmatpush.bf16.msra.mxu1 %v584_v12  ;;  %v611_v28 = vld [vmem:[%s869_s3] ss:$0 sm:$0xff]  ;;  %v588_v4 = vld [vmem:[%s873_s7 + $0x10] sm:$0xff]  ;;  %v587_v5 = vld [vmem:[%s873_s7 + $0x8] sm:$0xff] }
   0xa   :  { %595 = vmatpush.bf16.msra.mxu3 %v584_v12  ;;  %v590_v54 = vld [vmem:[%s873_s7 + $0x20] sm:$0xff] }
   0xb   :  { %v586_v6 = vld [vmem:[%s873_s7] sm:$0xff] }
   0xc   :  { %508 = vmatmul.msk.bf16.vlgmr.msra.gmra.mxu0 %vm71_vm1, %v52_v7  ;;  %603 = vmatpush.bf16.msra.mxu2 %v592_v47  ;;  %v612_v8 = vld [vmem:[%s871_s5] ss:$0 sm:$0xff] }
   0xd   :  { %219 = vmatpush.bf16.msra.mxu1 %v583_v13 }
   0xe   :  { %596 = vmatpush.bf16.msra.mxu3 %v583_v13 }
  0x10   :  { %604 = vmatpush.bf16.msra.mxu2 %v591_v49 }
  0x11   :  { %220 = vmatpush.bf16.msra.mxu1 %v582_v16 }
  0x12   :  { %597 = vmatpush.bf16.msra.mxu3 %v582_v16 }
  0x14   :  { %605 = vmatpush.bf16.msra.mxu2 %v590_v54 }
  0x15   :  { %221 = vmatpush.bf16.msra.mxu1 %v581_v21 }
  0x16   :  { %598 = vmatpush.bf16.msra.mxu3 %v581_v21 }
  0x18   :  { %606 = vmatpush.bf16.msra.mxu2 %v589_v3 }
  0x19   :  { %222 = vmatpush.bf16.msra.mxu1 %v580_v22 }
  0x1a   :  { %599 = vmatpush.bf16.msra.mxu3 %v580_v22 }
  0x1c   :  { %509 = vmatmul.msk.bf16.gmra.mxu0 %vm71_vm1, %v53_v10  ;;  %607 = vmatpush.bf16.msra.mxu2 %v588_v4  ;;  %v613_v10 = vld [vmem:[%s872_s6] ss:$0 sm:$0xff] }
  0x1d   :  { %223 = vmatpush.bf16.msra.mxu1 %v579_v23 }
  0x1e   :  { %600 = vmatpush.bf16.msra.mxu3 %v579_v23 }
  0x20   :  { %608 = vmatpush.bf16.msra.mxu2 %v587_v5 }
  0x21   :  { %224 = vmatpush.bf16.msra.mxu1 %v578_v24 }
  0x22   :  { %601 = vmatpush.bf16.msra.mxu3 %v578_v24 }
  0x24   :  { %609 = vmatpush.bf16.msra.mxu2 %v586_v6 }
  0x25   :  { %346 = vmatpush.bf16.msrb.mxu1 %v593_v46  ;;  %v615_v46 = vld [vmem:[%s875_s9] ss:$0 sm:$0xff] }
  0x29   :  { %347 = vmatpush.bf16.msrb.mxu1 %v592_v47 }
  0x2c   :  { %510 = vmatmul.msk.bf16.gmra.mxu0 %vm71_vm1, %v54_v17 }
  0x2d   :  { %348 = vmatpush.bf16.msrb.mxu1 %v591_v49 }
  0x31   :  { %349 = vmatpush.bf16.msrb.mxu1 %v590_v54 }
  0x35   :  { %350 = vmatpush.bf16.msrb.mxu1 %v589_v3 }
  0x39   :  { %351 = vmatpush.bf16.msrb.mxu1 %v588_v4 }
  0x3c   :  { %511 = vmatmul.msk.bf16.gmra.mxu0 %vm71_vm1, %v55_v20 }
  0x3d   :  { %352 = vmatpush.bf16.msrb.mxu1 %v587_v5 }
  0x41   :  { %353 = vmatpush.bf16.msrb.mxu1 %v586_v6  ;;  %v17_v6 = vstv %s877_s11 }
  0x42   :  { %18 = vst [vmem:[#allocation2] sm:$0x1] %v17_v6 }
  0x89   :  { %v97_v25 = vpop.f32.mrf.mxu0 }
  0x8a   :  { %v121_v27 = vmul.f32 %v610_v26, %v97_v25 }
  0x8c   :  { %v133_v30 = vadd.f32 %v611_v28, %v121_v27 }
  0x8e   :  { %v141_v33 = vmax.f32 %v133_v30, 0.0 }
  0x91   :  { %v99_v29 = vpop.f32.mrf.mxu0 }
  0x92   :  { %v122_v31 = vmul.f32 %v610_v26, %v99_v29 }
  0x94   :  { %v134_v32 = vadd.f32 %v611_v28, %v122_v31 }
  0x96   :  { %v142_v34 = vmax.f32 %v134_v32, 0.0 }
  0x98   :  { %v149_v35 = vpack.c.bf16 %v142_v34, %v141_v33 }
  0x99   :  { %v102_v36 = vpop.f32.mrf.mxu0 }
  0x9a   :  { %225 = vmatmul.bf16.vlgmr.msra.gmra.mxu1 %v149_v35  ;;  %v123_v37 = vmul.f32 %v610_v26, %v102_v36 }
  0x9c   :  { %v135_v39 = vadd.f32 %v611_v28, %v123_v37 }
  0x9e   :  { %v143_v42 = vmax.f32 %v135_v39, 0.0 }
  0xa1   :  { %v104_v38 = vpop.f32.mrf.mxu0 }
  0xa2   :  { %v124_v40 = vmul.f32 %v610_v26, %v104_v38 }
  0xa4   :  { %v136_v41 = vadd.f32 %v611_v28, %v124_v40 }
  0xa6   :  { %v144_v43 = vmax.f32 %v136_v41, 0.0 }
  0xa8   :  { %v150_v44 = vpack.c.bf16 %v144_v43, %v143_v42 }
  0xa9   :  { %v107_v45 = vpop.f32.mrf.mxu0 }
  0xaa   :  { %230 = vmatmul.bf16.vlgmr.msra.gmra.mxu3 %v150_v44  ;;  %v125_v48 = vmul.f32 %v610_v26, %v107_v45  ;;  %v614_v45 = vld [vmem:[%s874_s8] ss:$0 sm:$0xff] }
  0xac   :  { %v137_v51 = vadd.f32 %v611_v28, %v125_v48 }
  0xae   :  { %v145_v55 = vmax.f32 %v137_v51, 0.0 }
  0xb1   :  { %v109_v50 = vpop.f32.mrf.mxu0 }
  0xb2   :  { %v126_v52 = vmul.f32 %v610_v26, %v109_v50  ;;  %v616_v50 = vld [vmem:[%s876_s10] ss:$0 sm:$0xff] }
  0xb4   :  { %v138_v53 = vadd.f32 %v611_v28, %v126_v52 }
  0xb6   :  { %v146_v56 = vmax.f32 %v138_v53, 0.0 }
  0xb8   :  { %v151_v57 = vpack.c.bf16 %v146_v56, %v145_v55 }
  0xb9   :  { %v112_v58 = vpop.f32.mrf.mxu0 }
  0xba   :  { %235 = vmatmul.bf16.gmra.mxu3 %v151_v57  ;;  %v127_v59 = vmul.f32 %v610_v26, %v112_v58 }
  0xbc   :  { %v139_v61 = vadd.f32 %v611_v28, %v127_v59 }
  0xbe   :  { %v147_v0 = vmax.f32 %v139_v61, 0.0 }
  0xc1   :  { %v114_v60 = vpop.f32.mrf.mxu0 }
  0xc2   :  { %v128_v62 = vmul.f32 %v610_v26, %v114_v60 }
  0xc4   :  { %v140_v63 = vadd.f32 %v611_v28, %v128_v62 }
  0xc6   :  { %v148_v1 = vmax.f32 %v140_v63, 0.0 }
  0xc8   :  { %v152_v2 = vpack.c.bf16 %v148_v1, %v147_v0 }
  0xca   :  { %240 = vmatmul.bf16.gmra.mxu3 %v152_v2 }
 0x117   :  { %v226_v7 = vpop.f32.mrf.mxu1 }
 0x118   :  { %v250_v9 = vmul.f32 %v612_v8, %v226_v7 }
 0x11a   :  { %v262_v12 = vadd.f32 %v613_v10, %v250_v9 }
 0x11c   :  { %v270_v15 = vmax.f32 %v262_v12, 0.0 }
 0x11f   :  { %v228_v11 = vpop.f32.mrf.mxu1 }
 0x120   :  { %v251_v13 = vmul.f32 %v612_v8, %v228_v11 }
 0x122   :  { %v263_v14 = vadd.f32 %v613_v10, %v251_v13 }
 0x124   :  { %v271_v16 = vmax.f32 %v263_v14, 0.0 }
 0x126   :  { %v278_v17 = vpack.c.bf16 %v271_v16, %v270_v15 }
 0x128   :  { %354 = vmatmul.bf16.vlgmr.msrb.gmra.mxu1 %v278_v17 }
 0x12d   :  { %v231_v18 = vpop.f32.mrf.mxu3 }
 0x12e   :  { %v252_v19 = vmul.f32 %v612_v8, %v231_v18 }
 0x130   :  { %v264_v21 = vadd.f32 %v613_v10, %v252_v19 }
 0x132   :  { %v272_v24 = vmax.f32 %v264_v21, 0.0 }
 0x135   :  { %v233_v20 = vpop.f32.mrf.mxu3 }
 0x136   :  { %v253_v22 = vmul.f32 %v612_v8, %v233_v20 }
 0x138   :  { %v265_v23 = vadd.f32 %v613_v10, %v253_v22 }
 0x13a   :  { %v273_v25 = vmax.f32 %v265_v23, 0.0 }
 0x13c   :  { %v279_v26 = vpack.c.bf16 %v273_v25, %v272_v24  ;;  %v824_v25 = vld [vmem:[#allocation2] ss:$0 sm:$0xff] }
 0x13d   :  { %v236_v27 = vpop.f32.mrf.mxu3 }
 0x13e   :  { %359 = vmatmul.bf16.vlgmr.msra.gmra.mxu2 %v279_v26  ;;  %v254_v28 = vmul.f32 %v612_v8, %v236_v27 }
 0x140   :  { %v266_v30 = vadd.f32 %v613_v10, %v254_v28 }
 0x142   :  { %v274_v33 = vmax.f32 %v266_v30, 0.0 }
 0x145   :  { %v238_v29 = vpop.f32.mrf.mxu3 }
 0x146   :  { %v255_v31 = vmul.f32 %v612_v8, %v238_v29 }
 0x148   :  { %v267_v32 = vadd.f32 %v613_v10, %v255_v31 }
 0x14a   :  { %v275_v34 = vmax.f32 %v267_v32, 0.0 }
 0x14c   :  { %v280_v35 = vpack.c.bf16 %v275_v34, %v274_v33 }
 0x14d   :  { %v241_v36 = vpop.f32.mrf.mxu3 }
 0x14e   :  { %364 = vmatmul.bf16.gmra.mxu2 %v280_v35  ;;  %v256_v37 = vmul.f32 %v612_v8, %v241_v36 }
 0x150   :  { %v268_v39 = vadd.f32 %v613_v10, %v256_v37 }
 0x152   :  { %v276_v42 = vmax.f32 %v268_v39, 0.0 }
 0x155   :  { %v243_v38 = vpop.f32.mrf.mxu3 }
 0x156   :  { %v257_v40 = vmul.f32 %v612_v8, %v243_v38 }
 0x158   :  { %v269_v41 = vadd.f32 %v613_v10, %v257_v40 }
 0x15a   :  { %v277_v43 = vmax.f32 %v269_v41, 0.0 }
 0x15c   :  { %v281_v44 = vpack.c.bf16 %v277_v43, %v276_v42 }
 0x15e   :  { %369 = vmatmul.bf16.gmra.mxu2 %v281_v44 }
 0x1a5   :  { %v355_v47 = vpop.f32.mrf.mxu1 }
 0x1a6   :  { %v379_v48 = vmul.f32 %v614_v45, %v355_v47 }
 0x1a8   :  { %v391_v49 = vadd.f32 %v615_v46, %v379_v48 }
 0x1aa   :  { %v399_v51 = vmax.f32 %v391_v49, 0.0 }
 0x1ac   :  { %v411_v52 = vmul.f32 %v616_v50, %v399_v51 }
 0x1ad   :  { %v357_v53 = vpop.f32.mrf.mxu1 }
 0x1ae   :  { %v380_v54 = vmul.f32 %v614_v45, %v357_v53  ;;  %419 = vadd.xlane.f32.xlu0 %v411_v52 }
 0x1b0   :  { %v392_v55 = vadd.f32 %v615_v46, %v380_v54 }
 0x1b2   :  { %v400_v56 = vmax.f32 %v392_v55, 0.0 }
 0x1b4   :  { %v412_v57 = vmul.f32 %v616_v50, %v400_v56 }
 0x1b6   :  { %421 = vadd.xlane.f32.xlu0 %v412_v57 }
 0x1c1   :  { %v360_v58 = vpop.f32.mrf.mxu2 }
 0x1c2   :  { %v381_v59 = vmul.f32 %v614_v45, %v360_v58 }
 0x1c4   :  { %v393_v60 = vadd.f32 %v615_v46, %v381_v59 }
 0x1c6   :  { %v401_v61 = vmax.f32 %v393_v60, 0.0 }
 0x1c8   :  { %v413_v62 = vmul.f32 %v616_v50, %v401_v61 }
 0x1c9   :  { %v362_v63 = vpop.f32.mrf.mxu2 }
 0x1ca   :  { %v382_v0 = vmul.f32 %v614_v45, %v362_v63  ;;  %423 = vadd.xlane.f32.xlu1 %v413_v62 }
 0x1cc   :  { %v394_v1 = vadd.f32 %v615_v46, %v382_v0 }
 0x1ce   :  { %v402_v2 = vmax.f32 %v394_v1, 0.0 }
 0x1d0   :  { %v414_v3 = vmul.f32 %v616_v50, %v402_v2 }
 0x1d1   :  { %v365_v4 = vpop.f32.mrf.mxu2 }
 0x1d2   :  { %v383_v5 = vmul.f32 %v614_v45, %v365_v4  ;;  %425 = vadd.xlane.f32.xlu1 %v414_v3 }
 0x1d4   :  { %v395_v7 = vadd.f32 %v615_v46, %v383_v5 }
 0x1d6   :  { %v403_v8 = vmax.f32 %v395_v7, 0.0 }
 0x1d8   :  { %v415_v9 = vmul.f32 %v616_v50, %v403_v8 }
 0x1d9   :  { %v367_v10 = vpop.f32.mrf.mxu2 }
 0x1da   :  { %v384_v11 = vmul.f32 %v614_v45, %v367_v10  ;;  %427 = vadd.xlane.f32.xlu2 %v415_v9 }
 0x1dc   :  { %v396_v12 = vadd.f32 %v615_v46, %v384_v11 }
 0x1de   :  { %v404_v13 = vmax.f32 %v396_v12, 0.0 }
 0x1e0   :  { %v416_v14 = vmul.f32 %v616_v50, %v404_v13 }
 0x1e1   :  { %v370_v15 = vpop.f32.mrf.mxu2 }
 0x1e2   :  { %v385_v16 = vmul.f32 %v614_v45, %v370_v15  ;;  %429 = vadd.xlane.f32.xlu2 %v416_v14 }
 0x1e4   :  { %v397_v17 = vadd.f32 %v615_v46, %v385_v16 }
 0x1e6   :  { %v405_v18 = vmax.f32 %v397_v17, 0.0 }
 0x1e8   :  { %v417_v19 = vmul.f32 %v616_v50, %v405_v18 }
 0x1e9   :  { %v372_v20 = vpop.f32.mrf.mxu2 }
 0x1ea   :  { %v386_v21 = vmul.f32 %v614_v45, %v372_v20  ;;  %431 = vadd.xlane.f32.xlu0 %v417_v19 }
 0x1ec   :  { %v398_v22 = vadd.f32 %v615_v46, %v386_v21 }
 0x1ee   :  { %v406_v23 = vmax.f32 %v398_v22, 0.0 }
 0x1f0   :  { %v418_v24 = vmul.f32 %v616_v50, %v406_v23 }
 0x1f2   :  { %433 = vadd.xlane.f32.xlu1 %v418_v24 }
 0x221   :  { %v420_v26 = vpop.xlane.xlu0 %419 }
 0x222   :  { %v439_v27 = vadd.f32 %v824_v25, %v420_v26 }
 0x224   :  { %v447_v28 = vsub.f32 0.0, %v439_v27 }
 0x226   :  { %v455_v29 = vmul.f32 1.442695, %v447_v28 }
 0x228   :  { %618 = vpow2.f32 %v455_v29 }
 0x229   :  { %v422_v30 = vpop.xlane.xlu0 %421 }
 0x22a   :  { %v440_v31 = vadd.f32 %v824_v25, %v422_v30 }
 0x22c   :  { %v448_v32 = vsub.f32 0.0, %v440_v31 }
 0x22e   :  { %v619_v33 = vpop.eup %618  ;;  %v457_v34 = vmul.f32 1.442695, %v448_v32 }
 0x22f   :  { %v471_v35 = vadd.f32 1.0, %v619_v33 }
 0x230   :  { %620 = vpow2.f32 %v457_v34 }
 0x231   :  { %622 = vrcp.f32 %v471_v35 }
 0x236   :  { %v621_v36 = vpop.eup %620 }
 0x237   :  { %v623_v37 = vpop.eup %622  ;;  %v472_v38 = vadd.f32 1.0, %v621_v36 }
 0x238   :  { %488 = vst.msk [vmem:[%s878_s12] sm:$0xff] %vm487_vm2, %v623_v37 }
 0x239   :  { %624 = vrcp.f32 %v472_v38 }
 0x23d   :  { %v424_v39 = vpop.xlane.xlu1 %423 }
 0x23e   :  { %v441_v40 = vadd.f32 %v824_v25, %v424_v39 }
 0x23f   :  { %v625_v41 = vpop.eup %624 }
 0x240   :  { %489 = vst.msk [vmem:[%s878_s12 + $0x8] sm:$0xff] %vm487_vm2, %v625_v41  ;;  %v449_v42 = vsub.f32 0.0, %v441_v40 }
 0x242   :  { %v459_v43 = vmul.f32 1.442695, %v449_v42 }
 0x244   :  { %626 = vpow2.f32 %v459_v43 }
 0x245   :  { %v426_v44 = vpop.xlane.xlu1 %425 }
 0x246   :  { %v442_v45 = vadd.f32 %v824_v25, %v426_v44 }
 0x248   :  { %v450_v46 = vsub.f32 0.0, %v442_v45 }
 0x24a   :  { %v627_v47 = vpop.eup %626  ;;  %v461_v48 = vmul.f32 1.442695, %v450_v46 }
 0x24b   :  { %v473_v49 = vadd.f32 1.0, %v627_v47 }
 0x24c   :  { %628 = vpow2.f32 %v461_v48 }
 0x24d   :  { %630 = vrcp.f32 %v473_v49  ;;  %v428_v50 = vpop.xlane.xlu2 %427 }
 0x24e   :  { %v443_v51 = vadd.f32 %v824_v25, %v428_v50 }
 0x250   :  { %v451_v52 = vsub.f32 0.0, %v443_v51 }
 0x252   :  { %v629_v53 = vpop.eup %628  ;;  %v463_v54 = vmul.f32 1.442695, %v451_v52 }
 0x253   :  { %v631_v55 = vpop.eup %630  ;;  %v474_v56 = vadd.f32 1.0, %v629_v53 }
 0x254   :  { %490 = vst.msk [vmem:[%s878_s12 + $0x10] sm:$0xff] %vm487_vm2, %v631_v55  ;;  %632 = vpow2.f32 %v463_v54 }
 0x255   :  { %634 = vrcp.f32 %v474_v56  ;;  %v430_v57 = vpop.xlane.xlu2 %429 }
 0x256   :  { %v444_v58 = vadd.f32 %v824_v25, %v430_v57 }
 0x258   :  { %v452_v59 = vsub.f32 0.0, %v444_v58 }
 0x25a   :  { %v633_v60 = vpop.eup %632  ;;  %v465_v61 = vmul.f32 1.442695, %v452_v59 }
 0x25b   :  { %v635_v62 = vpop.eup %634  ;;  %v475_v63 = vadd.f32 1.0, %v633_v60 }
 0x25c   :  { %491 = vst.msk [vmem:[%s878_s12 + $0x18] sm:$0xff] %vm487_vm2, %v635_v62  ;;  %636 = vpow2.f32 %v465_v61 }
 0x25d   :  { %638 = vrcp.f32 %v475_v63  ;;  %v432_v0 = vpop.xlane.xlu0 %431 }
 0x25e   :  { %v445_v1 = vadd.f32 %v824_v25, %v432_v0 }
 0x260   :  { %v453_v2 = vsub.f32 0.0, %v445_v1 }
 0x262   :  { %v637_v3 = vpop.eup %636  ;;  %v467_v4 = vmul.f32 1.442695, %v453_v2 }
 0x263   :  { %v639_v5 = vpop.eup %638  ;;  %v476_v6 = vadd.f32 1.0, %v637_v3 }
 0x264   :  { %492 = vst.msk [vmem:[%s878_s12 + $0x20] sm:$0xff] %vm487_vm2, %v639_v5  ;;  %640 = vpow2.f32 %v467_v4 }
 0x265   :  { %642 = vrcp.f32 %v476_v6  ;;  %v434_v7 = vpop.xlane.xlu1 %433 }
 0x266   :  { %v446_v8 = vadd.f32 %v824_v25, %v434_v7 }
 0x268   :  { %v454_v9 = vsub.f32 0.0, %v446_v8 }
 0x26a   :  { %v641_v10 = vpop.eup %640  ;;  %v469_v11 = vmul.f32 1.442695, %v454_v9 }
 0x26b   :  { %v643_v12 = vpop.eup %642  ;;  %v477_v13 = vadd.f32 1.0, %v641_v10 }
 0x26c   :  { %493 = vst.msk [vmem:[%s878_s12 + $0x28] sm:$0xff] %vm487_vm2, %v643_v12  ;;  %644 = vpow2.f32 %v469_v11 }
 0x26d   :  { %646 = vrcp.f32 %v477_v13 }
 0x272   :  { %v645_v14 = vpop.eup %644 }
 0x273   :  { %v647_v15 = vpop.eup %646  ;;  %v478_v16 = vadd.f32 1.0, %v645_v14 }
 0x274   :  { %494 = vst.msk [vmem:[%s878_s12 + $0x30] sm:$0xff] %vm487_vm2, %v647_v15 }
 0x275   :  { %648 = vrcp.f32 %v478_v16 }
 0x27b   :  { %v649_v17 = vpop.eup %648 }
 0x27c   :  { %495 = vst.msk [vmem:[%s878_s12 + $0x38] sm:$0xff] %vm487_vm2, %v649_v17 }

</bundles_post_ra>
